<compile_context>
chip_gen: v5e
topology: v5e:2x2
jax: 0.10.0
libtpu: 0.0.40
codegen_flags: <defaults>
</compile_context>

<pallas_src>
import functools

import jax
import jax.numpy as jnp
from jax import lax
from jax.experimental import pallas as pl
from jax.experimental.pallas import tpu as pltpu

_LANE = 128
_TARGET_BLOCK_BYTES = 2 * 1024 * 1024   # per input per pipeline buffer (=> 8 MiB total)


def _round_up(a, b):
    return (a + b - 1) // b * b


def _sublane_multiple(dtype):
    # Packed-sublane requirement: 8 rows for 4-byte, 16 for 2-byte, 32 for 1-byte.
    return max(8, 32 // jnp.dtype(dtype).itemsize)


def _tensorcores_per_chip():
    # v7x has 2 TensorCores per chip; v5e/v6e have 1.  Falling back to 1 is always
    # correct (just forgoes the 2x bandwidth split on v7x).
    try:
        kind = jax.devices()[0].device_kind.lower()
    except Exception:
        return 1
    return 2 if "v7" in kind else 1


def _partial_sums_kernel(x_ref, t_ref, out_ref, *, steps_per_core, tile_rows,
                         total_rows, needs_mask, two_cores):
    """Accumulate per-lane partial sums of x*t and t*t into the resident out block.

    x_ref, t_ref : (tile_rows, 128) VMEM tiles in the inputs' original dtypes
    out_ref      : (1, 2, 128) f32 block, resident across the reduction axis:
                   out[0, 0, :] = per-lane sum(x*t),  out[0, 1, :] = per-lane sum(t*t)
    """
    if two_cores:
        c = pl.program_id(0)       # CORE_PARALLEL axis (v7x TensorCore split)
        i = pl.program_id(1)       # arbitrary reduction axis (steps per core)
        blk = c * steps_per_core + i
    else:
        i = pl.program_id(0)
        blk = i

    @pl.when(i == 0)
    def _():
        out_ref[...] = jnp.zeros_like(out_ref)

    x = x_ref[...].astype(jnp.float32)   # per-tile upcast (bf16 / int8 stream native)
    t = t_ref[...].astype(jnp.float32)
    xt = x * t
    tt = t * t

    def _accumulate(xt_v, tt_v):
        # Single (2,128) read-modify-write instead of two (1,128) masked stores.
        partial = jnp.concatenate(
            [jnp.sum(xt_v, axis=0, keepdims=True),
             jnp.sum(tt_v, axis=0, keepdims=True)], axis=0)
        out_ref[0, :, :] += partial

    if needs_mask:
        # Only the partial last block and clamped duplicate blocks need masking;
        # interior tiles take the unmasked fast path (no iota / cmp / select).
        is_edge = (blk + 1) * tile_rows > total_rows

        @pl.when(is_edge)
        def _():
            row_ids = blk * tile_rows + lax.broadcasted_iota(jnp.int32, xt.shape, 0)
            valid = row_ids < total_rows
            zero = jnp.float32(0.0)
            _accumulate(jnp.where(valid, xt, zero), jnp.where(valid, tt, zero))

        @pl.when(jnp.logical_not(is_edge))
        def _():
            _accumulate(xt, tt)
    else:
        _accumulate(xt, tt)


def dice_loss(inputs, targets, smooth=1.0):
    """Pallas TPU implementation of DiceLoss.forward (any smooth value)."""
    assert inputs.shape == targets.shape, "inputs/targets must match shape"

    def _prep(a):
        a = jnp.reshape(a, (-1,))
        if a.dtype == jnp.bool_:
            a = a.astype(jnp.int8)       # keep 1 B/elem, avoid i1 vector refs
        elif jnp.dtype(a.dtype).itemsize > 4:
            a = a.astype(jnp.float32)    # no 64-bit vector path on TPU
        return a

    x = _prep(inputs)
    t = _prep(targets)

    n = x.shape[0]
    rows = n // _LANE
    n_aligned = rows * _LANE

    # Ragged tail (< 128 elements): tiny wrapper-side jnp correction instead of a
    # full-array jnp.pad copy of both inputs.
    tail_xt = jnp.float32(0.0)
    tail_tt = jnp.float32(0.0)
    if n_aligned != n:
        xt_tail = x[n_aligned:].astype(jnp.float32)
        tt_tail = t[n_aligned:].astype(jnp.float32)
        tail_xt = jnp.sum(xt_tail * tt_tail)
        tail_tt = jnp.sum(tt_tail * tt_tail)

    if rows == 0:
        sum_xt, sum_tt = tail_xt, tail_tt
    else:
        x2d = x[:n_aligned].reshape(rows, _LANE)   # reshape of contiguous data: cheap
        t2d = t[:n_aligned].reshape(rows, _LANE)

        num_cores = _tensorcores_per_chip()
        sub = max(_sublane_multiple(x2d.dtype), _sublane_multiple(t2d.dtype))
        max_itemsize = max(jnp.dtype(x2d.dtype).itemsize,
                           jnp.dtype(t2d.dtype).itemsize)
        # ~2 MiB per input block; 2 inputs x 2 pipeline buffers = 8 MiB VMEM,
        # under the default scoped limit on every generation (16 MiB on v5e).
        max_tile_rows = max(_TARGET_BLOCK_BYTES // (_LANE * max_itemsize), sub)

        tile_rows = min(max_tile_rows, _round_up(pl.cdiv(rows, num_cores), sub))
        if tile_rows > rows:
            tile_rows = rows                       # full-extent block: always legal
        n_blocks = pl.cdiv(rows, tile_rows)
        steps_per_core = pl.cdiv(n_blocks, num_cores)
        needs_mask = num_cores * steps_per_core * tile_rows > rows
        two_cores = num_cores > 1

        kernel = functools.partial(
            _partial_sums_kernel,
            steps_per_core=steps_per_core,
            tile_rows=tile_rows,
            total_rows=rows,
            needs_mask=needs_mask,
            two_cores=two_cores,
        )

        if two_cores:
            grid = (num_cores, steps_per_core)

            def in_map(c, i):
                # Clamp so duplicated trailing steps re-read the last block (which
                # the in-kernel edge mask then fully zeroes).
                return (jnp.minimum(c * steps_per_core + i, n_blocks - 1), 0)

            out_map = lambda c, i: (c, 0, 0)
            semantics = (pltpu.CORE_PARALLEL, pltpu.ARBITRARY)
        else:
            grid = (steps_per_core,)
            in_map = lambda i: (i, 0)
            out_map = lambda i: (0, 0, 0)
            semantics = (pltpu.ARBITRARY,)

        partials = pl.pallas_call(
            kernel,
            out_shape=jax.ShapeDtypeStruct((num_cores, 2, _LANE), jnp.float32),
            grid_spec=pltpu.PrefetchScalarGridSpec(
                num_scalar_prefetch=0,
                grid=grid,
                in_specs=[
                    pl.BlockSpec((tile_rows, _LANE), in_map),
                    pl.BlockSpec((tile_rows, _LANE), in_map),
                ],
                out_specs=pl.BlockSpec((1, 2, _LANE), out_map),
            ),
            compiler_params=pltpu.CompilerParams(dimension_semantics=semantics),
        )(x2d, t2d)

        # Tiny epilogue: combine per-core / per-lane partials + the ragged tail.
        sum_xt = jnp.sum(partials[:, 0, :]) + tail_xt   # == intersection == sum_a
        sum_tt = jnp.sum(partials[:, 1, :]) + tail_tt   # == sum_b

    smooth = jnp.float32(smooth)
    dice = (2.0 * sum_xt + smooth) / (sum_xt + sum_tt + smooth)
    return jnp.float32(1.0) - dice


def _dice_loss_ref(inputs, targets, smooth=1.0):
    x = jnp.reshape(inputs, (-1,)).astype(jnp.float32)
    t = jnp.reshape(targets, (-1,)).astype(jnp.float32)
    intersection = jnp.sum(x * t)
    sum_a = jnp.sum(x * t)
    sum_b = jnp.sum(t * t)
    dice = (2.0 * intersection + smooth) / (sum_a + sum_b + smooth)
    return 1.0 - dice


if __name__ == "__main__":
    key = jax.random.PRNGKey(0)
    k1, k2, k3, k4 = jax.random.split(key, 4)

    # Case 1: segmentation-head-like (B, C, H, W) = (2, 4, 16, 16), f32 inputs/targets.
    x1 = jax.nn.sigmoid(jax.random.normal(k1, (2, 4, 16, 16), dtype=jnp.float32))
    t1 = (jax.random.uniform(k2, (2, 4, 16, 16)) > 0.5).astype(jnp.float32)
    out1 = jax.block_until_ready(dice_loss(x1, t1))
    ref1 = jax.block_until_ready(_dice_loss_ref(x1, t1))
    assert jnp.allclose(out1, ref1, rtol=1e-5, atol=1e-6), (out1, ref1)

    # Case 2: int8 0/1 targets streamed natively (no wrapper-side f32 upcast).
    x2 = jax.nn.sigmoid(jax.random.normal(k3, (2, 4, 32, 32), dtype=jnp.float32))
    t2 = (jax.random.uniform(k4, (2, 4, 32, 32)) > 0.5).astype(jnp.int8)
    out2 = jax.block_until_ready(dice_loss(x2, t2))
    ref2 = jax.block_until_ready(_dice_loss_ref(x2, t2))
    assert jnp.allclose(out2, ref2, rtol=1e-5, atol=1e-6), (out2, ref2)

    # Case 3: ragged numel (3*5*7*11 = 1155, not a multiple of 128) -> tail path.
    x3 = jax.nn.sigmoid(jax.random.normal(k1, (3, 5, 7, 11), dtype=jnp.float32))
    t3 = (jax.random.uniform(k2, (3, 5, 7, 11)) > 0.5).astype(jnp.float32)
    out3 = jax.block_until_ready(dice_loss(x3, t3))
    ref3 = jax.block_until_ready(_dice_loss_ref(x3, t3))
    assert jnp.allclose(out3, ref3, rtol=1e-5, atol=1e-6), (out3, ref3)

    print("KERNEL_OK")
</pallas_src>

<mosaic_0001>
module attributes {stable_mosaic.version = 11 : i64} {
  func.func @_partial_sums_kernel(%arg0: i32, %arg1: memref<16x128xf32, #tpu.memory_space<vmem>>, %arg2: memref<16x128xf32, #tpu.memory_space<vmem>>, %arg3: memref<1x2x128xf32, #tpu.memory_space<vmem>>) attributes {dimension_semantics = [#tpu.dimension_semantics<arbitrary>], iteration_bounds = array<i64: 1>, scalar_prefetch = 0 : i64, scratch_operands = 0 : i64, tpu.core_type = #tpu.core_type<tc>, window_params = [{transform_indices = @transform_0, window_bounds = array<i64: 16, 128>}, {transform_indices = @transform_1, window_bounds = array<i64: 16, 128>}, {pipeline_mode = #tpu.pipeline_mode<synchronous>, transform_indices = @transform_2, window_bounds = array<i64: 1, 2, 128>}]} {
    %c0_i32 = arith.constant 0 : i32
    %0 = arith.cmpi eq, %arg0, %c0_i32 : i32
    %1 = arith.extui %0 : i1 to i32
    %c0_i32_0 = arith.constant 0 : i32
    %2 = arith.cmpi ne, %1, %c0_i32_0 : i32
    scf.if %2 {
      %cst_11 = arith.constant 0.000000e+00 : f32
      %18 = vector.broadcast %cst_11 : f32 to vector<1x2x128xf32>
      %c0_12 = arith.constant 0 : index
      %c0_13 = arith.constant 0 : index
      %c0_14 = arith.constant 0 : index
      %19 = vector.load %arg3[%c0_12, %c0_13, %c0_14] : memref<1x2x128xf32, #tpu.memory_space<vmem>>, vector<1x2x128xf32>
      tpu.vector_store %arg3[%c0_12, %c0_13, %c0_14], %18 {strides = array<i32>} : memref<1x2x128xf32, #tpu.memory_space<vmem>>, vector<1x2x128xf32>,
    } else {
    }
    %c0 = arith.constant 0 : index
    %c0_1 = arith.constant 0 : index
    %3 = vector.load %arg1[%c0, %c0_1] : memref<16x128xf32, #tpu.memory_space<vmem>>, vector<16x128xf32>
    %c0_2 = arith.constant 0 : index
    %c0_3 = arith.constant 0 : index
    %4 = vector.load %arg2[%c0_2, %c0_3] : memref<16x128xf32, #tpu.memory_space<vmem>>, vector<16x128xf32>
    %5 = arith.mulf %3, %4 : vector<16x128xf32>
    %6 = arith.mulf %4, %4 : vector<16x128xf32>
    %cst = arith.constant dense<0.000000e+00> : vector<128xf32>
    %7 = vector.multi_reduction <add>, %5, %cst [0] : vector<16x128xf32> to vector<128xf32>
    %8 = vector.shape_cast %7 : vector<128xf32> to vector<1x128xf32>
    %cst_4 = arith.constant dense<0.000000e+00> : vector<128xf32>
    %9 = vector.multi_reduction <add>, %6, %cst_4 [0] : vector<16x128xf32> to vector<128xf32>
    %10 = vector.shape_cast %9 : vector<128xf32> to vector<1x128xf32>
    %11 = tpu.concatenate %8, %10 in 0 : vector<1x128xf32>, vector<1x128xf32> -> vector<2x128xf32>
    %c0_5 = arith.constant 0 : index
    %c0_6 = arith.constant 0 : index
    %c0_7 = arith.constant 0 : index
    %12 = vector.load %arg3[%c0_5, %c0_6, %c0_7] : memref<1x2x128xf32, #tpu.memory_space<vmem>>, vector<1x2x128xf32>
    %13 = vector.shape_cast %12 : vector<1x2x128xf32> to vector<2x128xf32>
    %14 = arith.addf %13, %11 : vector<2x128xf32>
    %c0_8 = arith.constant 0 : index
    %c0_9 = arith.constant 0 : index
    %c0_10 = arith.constant 0 : index
    %15 = vector.load %arg3[%c0_8, %c0_9, %c0_10] : memref<1x2x128xf32, #tpu.memory_space<vmem>>, vector<1x2x128xf32>
    %16 = vector.shape_cast %15 : vector<1x2x128xf32> to vector<2x128xf32>
    %17 = vector.shape_cast %14 : vector<2x128xf32> to vector<1x2x128xf32>
    tpu.vector_store %arg3[%c0_8, %c0_9, %c0_10], %17 {strides = array<i32>} : memref<1x2x128xf32, #tpu.memory_space<vmem>>, vector<1x2x128xf32>,
    return
  }
  func.func @transform_0(%arg0: i32) -> (i32, i32) {
    %c0_i32 = arith.constant 0 : i32
    %c0_i32_0 = arith.constant 0 : i32
    return %arg0, %c0_i32 : i32, i32
  }
  func.func @transform_1(%arg0: i32) -> (i32, i32) {
    %c0_i32 = arith.constant 0 : i32
    %c0_i32_0 = arith.constant 0 : i32
    return %arg0, %c0_i32 : i32, i32
  }
  func.func @transform_2(%arg0: i32) -> (i32, i32, i32) {
    %c0_i32 = arith.constant 0 : i32
    %c0_i32_0 = arith.constant 0 : i32
    %c0_i32_1 = arith.constant 0 : i32
    %c0_i32_2 = arith.constant 0 : i32
    return %c0_i32, %c0_i32_0, %c0_i32_1 : i32, i32, i32
  }
}

</mosaic_0001>

<bundles_post_ra>
// kernel: tpu_custom_call.1
= control target key start
LH: loop header
LB: loop body
LE: loop exit
PB: predicated region body
PF: predicated region fallthrough
CT: control target
= control target key end

     0   :  { %7 = vsyncpa [#allocation3], 0  ;;  %s208_s0 = inlined_call_operand.hbm [shape: f32[16,128], index: 0, kind: input, shape index: {}]   ;;  %s209_s1 = inlined_call_operand.hbm [shape: f32[16,128], index: 1, kind: input, shape index: {}]   ;;  %s210_s2 = inlined_call_operand.hbm [shape: f32[1,2,128], index: 2, kind: output, shape index: {}]  }
   0x1   :  { %8 = vsyncpa [#allocation6], 0 }
   0x2   :  { %9 = vsyncpa [#allocation4], 0  ;;  %s14_s11 = sshll.u32 %s208_s0, 4  ;;  %s178_s12 = smov [#allocation2]   ;;  %s15_s11 = int_to_ptr.hbm [resolvable:$true] %s14_s11 }
   0x3   :  { %s16_s13 = sshll.u32 %s178_s12, 4  ;;  %s27_s16 = sshll.u32 %s209_s1, 4  ;;  %s17_s13 = int_to_ptr.vmem [resolvable:$true] %s16_s13  ;;  %s28_s16 = int_to_ptr.hbm [resolvable:$true] %s27_s16 }
   0x4   :  { %s179_s17 = smov 128   ;;  %s180_s18 = smov 8  }
   0x5   :  { %22 = dma.hbm_to_vmem [thread:$0]  %s15_s11, 256, %s17_s13, [#allocation3], %s179_s17, %s179_s17, %s180_s18  }
   0x6   :  { %s181_s19 = smov [#allocation5]  }
   0x7   :  { %s29_s20 = sshll.u32 %s181_s19, 4  ;;  %s30_s20 = int_to_ptr.vmem [resolvable:$true] %s29_s20 }
   0x8   :  { %35 = dma.hbm_to_vmem [thread:$0]  %s28_s16, 256, %s30_s20, [#allocation6], %s179_s17, %s179_s17, %s180_s18  }
   0x9   :  { %172 = dma.done.wait [#allocation3], 256  }
   0xa   :  { %173 = vsyncadd [#allocation3], 4294967040 }
   0xb   :  { %174 = dma.done.wait [#allocation6], 256  }
   0xc   :  { %175 = vsyncadd [#allocation6], 4294967040  ;;  %v182_v0 = vmov 0.0   ;;  %v49_v1 = vld [vmem:[#allocation2] sm:$0xff]  ;;  %v50_v2 = vld [vmem:[#allocation2 + $0x8] sm:$0xff]  ;;  %vm71_vm0 = vcmask 1040384  }
   0xd   :  { %48 = vst [vmem:[#allocation7] sm:$0x3] %v182_v0  ;;  %v51_v3 = vld [vmem:[#allocation5] sm:$0xff]  ;;  %v52_v4 = vld [vmem:[#allocation5 + $0x8] sm:$0xff]  ;;  %s183_s0 = smov [#allocation7]   ;;  %s83_s23 = sshll.u32 %s210_s2, 4  ;;  %s84_s23 = int_to_ptr.hbm [resolvable:$true] %s83_s23 }
   0xe   :  { %v53_v5 = vmul.f32 %v51_v3, %v49_v1  ;;  %v55_v6 = vmul.f32 %v51_v3, %v51_v3  ;;  %v54_v7 = vmul.f32 %v52_v4, %v50_v2  ;;  %v56_v8 = vmul.f32 %v52_v4, %v52_v4  ;;  %s81_s1 = sshll.u32 %s183_s0, 4  ;;  %s82_s1 = int_to_ptr.vmem [resolvable:$true] %s81_s1 }
  0x10   :  { %v57_v9 = vadd.f32 %v54_v7, %v53_v5  ;;  %v64_v10 = vadd.f32 %v56_v8, %v55_v6 }
  0x12   :  { %v58_v11 = vrot.slane %v57_v9, 4  ;;  %v65_v12 = vrot.slane %v64_v10, 4 }
  0x14   :  { %v59_v13 = vadd.f32 %v58_v11, %v57_v9  ;;  %v66_v14 = vadd.f32 %v65_v12, %v64_v10  ;;  %v73_v23 = vld [vmem:[#allocation7] sm:$0x3] }
  0x16   :  { %v60_v15 = vrot.slane %v59_v13, 2  ;;  %v67_v16 = vrot.slane %v66_v14, 2 }
  0x18   :  { %v61_v17 = vadd.f32 %v60_v15, %v59_v13  ;;  %v68_v18 = vadd.f32 %v67_v16, %v66_v14 }
  0x1a   :  { %v62_v19 = vrot.slane %v61_v17, 1  ;;  %v69_v20 = vrot.slane %v68_v18, 1 }
  0x1c   :  { %v63_v21 = vadd.f32 %v62_v19, %v61_v17  ;;  %v70_v22 = vadd.f32 %v69_v20, %v68_v18 }
  0x1e   :  { %v72_v24 = vsel %vm71_vm0, %v63_v21, %v70_v22 }
  0x1f   :  { %v74_v25 = vadd.f32 %v73_v23, %v72_v24 }
  0x21   :  { %75 = vst [vmem:[#allocation7] sm:$0x3] %v74_v25 }
  0x22   :  { %86 = dma.vmem_to_hbm [thread:$0]  %s82_s1, 32, %s84_s23, [#allocation4]  }
  0x23   :  { %176 = dma.done.wait [#allocation4], 32  }
  0x24   :  { %177 = vsyncadd [#allocation4], 4294967264 }
  0x25   :  { %91 = vsyncpa [#allocation3], 1 }
  0x26   :  { %92 = vsyncpa [#allocation6], 1 }
  0x27   :  { %93 = vsyncpa [#allocation4], 1 }

</bundles_post_ra>
